<compile_context>
chip_gen: v7x
topology: tpu7x:2x2x1
jax: 0.10.0
libtpu: 0.0.40
codegen_flags: <defaults>
</compile_context>

<pallas_src>
import functools

import jax
import jax.numpy as jnp
from jax.experimental import pallas as pl
from jax.experimental.pallas import tpu as pltpu

LAYER_NORM_EPS = 1e-12  # ViTConfig default layer_norm_eps


def _round_up(x: int, m: int) -> int:
    return (x + m - 1) // m * m


def _ln_cls_classifier_kernel(x_ref, w_ref, b_ref, o_ref):
    # x_ref: (bt, H) CLS rows; w_ref: (H, tn) affine-folded weight; b_ref: (1, tn); o_ref: (bt, tn)
    x = x_ref[...].astype(jnp.float32)

    # LayerNorm statistics over the hidden axis (biased variance, eps inside rsqrt).
    mean = jnp.mean(x, axis=-1, keepdims=True)
    xc = x - mean
    var = jnp.mean(xc * xc, axis=-1, keepdims=True)
    y = xc * jax.lax.rsqrt(var + LAYER_NORM_EPS)          # gamma/beta folded into w/b

    # Classifier GEMM on the MXU (bf16 weights by default, f32 accumulation).
    y = y.astype(w_ref.dtype)
    acc = jnp.dot(y, w_ref[...], preferred_element_type=jnp.float32)
    o_ref[...] = (acc + b_ref[...]).astype(o_ref.dtype)


def prepare_vit_classifier_params(gamma, beta, weight, bias, *, use_bf16=True):
    """One-time (outside the hot path) fold / transpose / cast of the parameters.

    gamma, beta : (H,)   LayerNorm affine parameters
    weight      : (L, H) torch nn.Linear layout (out_features, in_features)
    bias        : (L,)

    LayerNorm affine is folded into the classifier (exact algebra, done in f32):
        LN(x) @ W.T + b = x_hat @ (gamma[:,None] * W.T) + (beta @ W.T + b)
    """
    H = int(gamma.shape[0])
    L = int(weight.shape[0])
    # TODO(synk): config.num_labels == 0 (classifier = nn.Identity) is not covered here.

    w_t = weight.astype(jnp.float32).T                                  # (H, L)
    w_folded = gamma.astype(jnp.float32)[:, None] * w_t                 # (H, L)
    b_folded = beta.astype(jnp.float32) @ w_t + bias.astype(jnp.float32)  # (L,)

    w_dtype = jnp.bfloat16 if use_bf16 else jnp.float32
    return {
        "w": w_folded.astype(w_dtype),                 # (H, L), transposed + affine-folded
        "bias": b_folded.reshape(1, L),                # (1, L), f32
    }


def vit_classifier_pipe(hidden_states, params, *, b_tile=256, l_tile=2048,
                        out_dtype=jnp.float32):
    """hidden_states: (B, S, H); returns logits (B, num_labels) in out_dtype."""
    B, S, H = hidden_states.shape
    w = params["w"]
    bias = params["bias"]
    L = int(w.shape[1])

    # Batch tile: multiple of 8 and <= B (or == B when B < 8), capped at b_tile.
    if B < 8:
        bt = B
    else:
        bt = max(8, (min(b_tile, B) // 8) * 8)
    nb = pl.cdiv(B, bt)

    # Label tile: multiple of 128 and <= L (or == L when L < 128), capped at l_tile.
    if L < 128:
        tn = L
    else:
        tn = max(128, (min(l_tile, L) // 128) * 128)
    nl = pl.cdiv(L, tn)

    # CLS gather inside the kernel's DMA: (B, S, H) -> (B, S*H) is a free reshape,
    # and the x block then covers columns [0, H) == token 0 of every batch row
    # (a strided HBM window, double-buffered by the Pallas pipeline).
    if H % 128 == 0 or S == 1:
        x = hidden_states.reshape(B, S * H)
    else:
        # TODO(synk): lane-unaligned hidden sizes (e.g. H=192) fall back to an XLA-side
        # CLS slice; an in-kernel gather would need pl.ANY + manual make_async_copy.
        x = hidden_states[:, 0, :]

    # VMEM budget hint (double-buffered tiles + margin), clamped for v7x's 64 MiB.
    x_bytes = bt * H * x.dtype.itemsize
    w_bytes = H * tn * w.dtype.itemsize
    o_bytes = bt * tn * jnp.dtype(out_dtype).itemsize
    est_vmem = 2 * (x_bytes + w_bytes + o_bytes + tn * 4)
    vmem_limit = int(min(max(est_vmem * 3 // 2 + (2 << 20), 32 << 20), 64 << 20))

    cost = pl.CostEstimate(
        flops=2 * B * H * L,
        transcendentals=0,
        bytes_accessed=int(B * H * x.dtype.itemsize + H * L * w.dtype.itemsize
                           + L * 4 + B * L * jnp.dtype(out_dtype).itemsize),
    )

    return pl.pallas_call(
        _ln_cls_classifier_kernel,
        out_shape=jax.ShapeDtypeStruct((B, L), out_dtype),
        grid=(nl, nb),                                      # label tiles outer, batch inner
        in_specs=[
            pl.BlockSpec((bt, H), lambda j, i: (i, 0)),     # CLS rows (strided HBM window)
            pl.BlockSpec((H, tn), lambda j, i: (0, j)),     # folded weight (constant over i)
            pl.BlockSpec((1, tn), lambda j, i: (0, j)),     # folded bias
        ],
        out_specs=pl.BlockSpec((bt, tn), lambda j, i: (i, j)),
        compiler_params=pltpu.CompilerParams(
            dimension_semantics=("parallel", "parallel"),   # megacore-shardable (v7x)
            vmem_limit_bytes=vmem_limit,
        ),
        cost_estimate=cost,
    )(x, w, bias)


def vit_classifier_ref(hidden_states, gamma, beta, weight, bias):
    x = hidden_states.astype(jnp.float32)
    mean = jnp.mean(x, axis=-1, keepdims=True)
    var = jnp.mean((x - mean) ** 2, axis=-1, keepdims=True)
    y = (x - mean) / jnp.sqrt(var + LAYER_NORM_EPS) * gamma + beta
    return y[:, 0, :] @ weight.astype(jnp.float32).T + bias


def _run_case(key, *, B, S, H, L, use_bf16, b_tile=256, l_tile=2048,
              out_dtype=jnp.float32, atol, rtol, name=""):
    k_x, k_g, k_b, k_w, k_bias = jax.random.split(key, 5)
    hidden_states = jax.random.normal(k_x, (B, S, H), dtype=jnp.float32)
    gamma = 1.0 + 0.01 * jax.random.normal(k_g, (H,), dtype=jnp.float32)
    beta = 0.01 * jax.random.normal(k_b, (H,), dtype=jnp.float32)
    weight = 0.05 * jax.random.normal(k_w, (L, H), dtype=jnp.float32)   # (out, in)
    bias = 0.05 * jax.random.normal(k_bias, (L,), dtype=jnp.float32)

    ref = vit_classifier_ref(hidden_states, gamma, beta, weight, bias)
    params = prepare_vit_classifier_params(gamma, beta, weight, bias, use_bf16=use_bf16)
    fn = jax.jit(functools.partial(vit_classifier_pipe, params=params,
                                   b_tile=b_tile, l_tile=l_tile, out_dtype=out_dtype))
    out = jax.block_until_ready(fn(hidden_states))
    assert out.shape == (B, L), (name, out.shape, (B, L))
    assert out.dtype == jnp.dtype(out_dtype), (name, out.dtype)
    assert jnp.allclose(out.astype(jnp.float32), ref, atol=atol, rtol=rtol), (
        f"{name}: kernel output mismatch vs reference")


if __name__ == "__main__":
    keys = jax.random.split(jax.random.PRNGKey(0), 4)

    # 1) In-kernel CLS gather (H % 128 == 0), f32 weights: tight tolerance.
    _run_case(keys[0], B=2, S=8, H=128, L=8, use_bf16=False,
              atol=1e-4, rtol=1e-4, name="fast_f32")

    # 2) In-kernel gather, ragged batch + multi-tile grid, bf16 MXU path.
    _run_case(keys[1], B=20, S=8, H=128, L=8, use_bf16=True, b_tile=8,
              atol=3e-2, rtol=3e-2, name="fast_bf16_ragged")

    # 3) Lane-unaligned hidden size -> XLA-slice fallback path.
    _run_case(keys[2], B=20, S=8, H=96, L=8, use_bf16=True, b_tile=8,
              atol=3e-2, rtol=3e-2, name="fallback_bf16")

    # 4) bf16 logits output option.
    _run_case(keys[3], B=2, S=8, H=128, L=8, use_bf16=True,
              out_dtype=jnp.bfloat16, atol=5e-2, rtol=5e-2, name="bf16_logits")

    print("KERNEL_OK")
</pallas_src>

<mosaic_0001>
module attributes {stable_mosaic.version = 11 : i64} {
  func.func @_ln_cls_classifier_kernel(%arg0: i32, %arg1: i32, %arg2: memref<2x128xf32, #tpu.memory_space<vmem>>, %arg3: memref<128x8xf32, #tpu.memory_space<vmem>>, %arg4: memref<1x8xf32, #tpu.memory_space<vmem>>, %arg5: memref<2x8xf32, #tpu.memory_space<vmem>>) attributes {dimension_semantics = [#tpu.dimension_semantics<parallel>, #tpu.dimension_semantics<parallel>], iteration_bounds = array<i64: 1, 1>, scalar_prefetch = 0 : i64, scratch_operands = 0 : i64, tpu.core_type = #tpu.core_type<tc>, window_params = [{transform_indices = @transform_0, window_bounds = array<i64: 2, 128>}, {transform_indices = @transform_1, window_bounds = array<i64: 128, 8>}, {transform_indices = @transform_2, window_bounds = array<i64: 1, 8>}, {transform_indices = @transform_3, window_bounds = array<i64: 2, 8>}]} {
    %c0 = arith.constant 0 : index
    %c0_0 = arith.constant 0 : index
    %0 = vector.load %arg2[%c0, %c0_0] : memref<2x128xf32, #tpu.memory_space<vmem>>, vector<2x128xf32>
    %cst = arith.constant dense<0.000000e+00> : vector<2xf32>
    %1 = vector.multi_reduction <add>, %0, %cst [1] : vector<2x128xf32> to vector<2xf32>
    %2 = vector.shape_cast %1 : vector<2xf32> to vector<2x1xf32>
    %cst_1 = arith.constant 1.280000e+02 : f32
    %3 = vector.broadcast %cst_1 : f32 to vector<2x1xf32>
    %4 = arith.divf %2, %3 : vector<2x1xf32>
    %5 = vector.broadcast %4 : vector<2x1xf32> to vector<2x128xf32>
    %6 = arith.subf %0, %5 : vector<2x128xf32>
    %7 = arith.mulf %6, %6 : vector<2x128xf32>
    %cst_2 = arith.constant dense<0.000000e+00> : vector<2xf32>
    %8 = vector.multi_reduction <add>, %7, %cst_2 [1] : vector<2x128xf32> to vector<2xf32>
    %9 = vector.shape_cast %8 : vector<2xf32> to vector<2x1xf32>
    %cst_3 = arith.constant 1.280000e+02 : f32
    %10 = vector.broadcast %cst_3 : f32 to vector<2x1xf32>
    %11 = arith.divf %9, %10 : vector<2x1xf32>
    %cst_4 = arith.constant 9.99999996E-13 : f32
    %12 = vector.broadcast %cst_4 : f32 to vector<2x1xf32>
    %13 = arith.addf %11, %12 : vector<2x1xf32>
    %14 = math.rsqrt %13 : vector<2x1xf32>
    %15 = vector.broadcast %14 : vector<2x1xf32> to vector<2x128xf32>
    %16 = arith.mulf %6, %15 : vector<2x128xf32>
    %c0_5 = arith.constant 0 : index
    %c0_6 = arith.constant 0 : index
    %17 = vector.load %arg3[%c0_5, %c0_6] : memref<128x8xf32, #tpu.memory_space<vmem>>, vector<128x8xf32>
    %cst_7 = arith.constant dense<0.000000e+00> : vector<2x8xf32>
    %18 = tpu.matmul %16, %17, %cst_7 {dimension_numbers = #tpu.dot_dimension_numbers<[1], [0], [0], [1], [0, 0, 1, 1], [], []>} : vector<2x128xf32>, vector<128x8xf32>, vector<2x8xf32> -> vector<2x8xf32>
    %c0_8 = arith.constant 0 : index
    %c0_9 = arith.constant 0 : index
    %19 = vector.load %arg4[%c0_8, %c0_9] : memref<1x8xf32, #tpu.memory_space<vmem>>, vector<1x8xf32>
    %20 = vector.broadcast %19 : vector<1x8xf32> to vector<2x8xf32>
    %21 = arith.addf %18, %20 : vector<2x8xf32>
    %c0_10 = arith.constant 0 : index
    %c0_11 = arith.constant 0 : index
    %22 = vector.load %arg5[%c0_10, %c0_11] : memref<2x8xf32, #tpu.memory_space<vmem>>, vector<2x8xf32>
    tpu.vector_store %arg5[%c0_10, %c0_11], %21 {strides = array<i32>} : memref<2x8xf32, #tpu.memory_space<vmem>>, vector<2x8xf32>,
    return
  }
  func.func @transform_0(%arg0: i32, %arg1: i32) -> (i32, i32) {
    %c0_i32 = arith.constant 0 : i32
    %c0_i32_0 = arith.constant 0 : i32
    return %arg1, %c0_i32 : i32, i32
  }
  func.func @transform_1(%arg0: i32, %arg1: i32) -> (i32, i32) {
    %c0_i32 = arith.constant 0 : i32
    %c0_i32_0 = arith.constant 0 : i32
    return %c0_i32, %arg0 : i32, i32
  }
  func.func @transform_2(%arg0: i32, %arg1: i32) -> (i32, i32) {
    %c0_i32 = arith.constant 0 : i32
    %c0_i32_0 = arith.constant 0 : i32
    return %c0_i32, %arg0 : i32, i32
  }
  func.func @transform_3(%arg0: i32, %arg1: i32) -> (i32, i32) {
    %c0_i32 = arith.constant 0 : i32
    return %arg1, %arg0 : i32, i32
  }
}

</mosaic_0001>

<bundles_post_ra>
// kernel: vit_classifier_pipe.1
= control target key start
LH: loop header
LB: loop body
LE: loop exit
PB: predicated region body
PF: predicated region fallthrough
CT: control target
= control target key end

     0   :  { %8 = vsyncpa [#allocation3], 0  ;;  %s348_s0 = inlined_call_operand.vmem [shape: f32[2,1024], index: 0, kind: input, shape index: {}]   ;;  %s349_s1 = inlined_call_operand.hbm [shape: f32[128,8], index: 1, kind: input, shape index: {}]   ;;  %s350_s2 = inlined_call_operand.vmem [shape: f32[1,8], index: 2, kind: input, shape index: {}]   ;;  %s351_s3 = inlined_call_operand.hbm [shape: f32[2,8], index: 3, kind: output, shape index: {}]  }
   0x1   :  { %9 = vsyncpa [#allocation4], 0  ;;  %s289_s12 = smov [#allocation2]   ;;  %s241_s16 = scalar_lea.hbm %s349_s1, 2048 }
   0x2   :  { %s17_s13 = sshll.u32 %s289_s12, 4  ;;  %p242_p0 = scmp.ne.s32.totalorder %s349_s1, %s241_s16  ;;  %s18_s13 = int_to_ptr.vmem [resolvable:$true] %s17_s13 }
   0x3   :  { %p245_p1 = scmp.lt.u32.totalorder %s241_s16, %s349_s1 }
   0x5   :  { %p247_p2 = pnand %p245_p1, %p242_p0 }
   0x7   :  { %250 = shalt.err (!%p247_p2)
}
   0x8   :  { %s251_s21 = scalar_lea.vmem %s18_s13, 2048  ;;  %p256_p4 = scmp.lt.s32.totalorder %s18_s13, %s18_s13 }
   0x9   :  { %p252_p3 = scmp.ne.s32.totalorder %s18_s13, %s251_s21  ;;  %p257_p5 = scmp.lt.s32.totalorder %s251_s21, %s251_s21 }
   0xb   :  { %p258_p6 = por %p257_p5, %p256_p4 }
   0xd   :  { %p259_p7 = pnand %p258_p6, %p252_p3 }
   0xf   :  { %262 = shalt.err (!%p259_p7)
}
  0x10   :  { %s290_s22 = smov 128   ;;  %s291_s23 = smov 8  }
  0x11   :  { %23 = dma.hbm_to_vmem [thread:$0]  %s349_s1, 2048, %s18_s13, [#allocation3], %s290_s22, %s290_s22, %s291_s23  }
  0x12   :  { %285 = dma.done.wait [#allocation3], 2048  }
  0x13   :  { %286 = vsyncadd [#allocation3], 4294965248  ;;  %vm30_vm0 = vcmask 1041408   ;;  %v29_v0 = vld [vmem:[%s348_s0] sm:$0x3]  ;;  %v46_v3 = vld [vmem:[#allocation2 + $0x8] sm:$0xff] }
  0x14   :  { %v31_v1 = vsel %vm30_vm0, %v29_v0, 0.0  ;;  %v45_v2 = vld [vmem:[#allocation2] sm:$0xff]  ;;  %v47_v4 = vld [vmem:[#allocation2 + $0x10] sm:$0xff]  ;;  %v292_v5 = vmov 0.0|0.0   ;;  %v48_v7 = vld [vmem:[#allocation2 + $0x18] sm:$0xff]  ;;  %vm293_vm1 = vmmov 0  }
  0x15   :  { %32 = vadd.xlane.f32.xlu0 %v31_v1  ;;  %208 = vmatprep.subr.bf16.mxu0 %v292_v5  ;;  %v209_v6 = vpack.c.bf16 %v46_v3, %v45_v2  ;;  %v212_v8 = vpack.c.bf16 %v48_v7, %v47_v4  ;;  %v49_v9 = vld [vmem:[#allocation2 + $0x20] sm:$0xff]  ;;  %v50_v10 = vld [vmem:[#allocation2 + $0x28] sm:$0xff]  ;;  %v51_v12 = vld [vmem:[#allocation2 + $0x30] sm:$0xff]  ;;  %v294_v28 = vmov 0.0   ;;  %s295_s28 = smov [#allocation5]   ;;  %vm138_vm2 = vcmask 58368  }
  0x16   :  { %v215_v11 = vpack.c.bf16 %v50_v10, %v49_v9  ;;  %v52_v13 = vld [vmem:[#allocation2 + $0x38] sm:$0xff]  ;;  %v53_v20 = vld [vmem:[#allocation2 + $0x40] sm:$0xff]  ;;  %v54_v21 = vld [vmem:[#allocation2 + $0x48] sm:$0xff]  ;;  %205 = vmatprep.mubr.msk.f32.mxu0 %vm293_vm1, %v294_v28  ;;  %s146_s29 = sshll.u32 %s295_s28, 4  ;;  %s147_s29 = int_to_ptr.vmem [resolvable:$true] %s146_s29 }
  0x17   :  { %210 = vmatpush3.bf16.msra.mxu0 %v209_v6  ;;  %v218_v14 = vpack.c.bf16 %v52_v13, %v51_v12  ;;  %v221_v22 = vpack.c.bf16 %v54_v21, %v53_v20  ;;  %v55_v23 = vld [vmem:[#allocation2 + $0x50] sm:$0xff]  ;;  %v56_v24 = vld [vmem:[#allocation2 + $0x58] sm:$0xff]  ;;  %v57_v26 = vld [vmem:[#allocation2 + $0x60] sm:$0xff]  ;;  %s263_s30 = scalar_lea.vmem %s147_s29, 32  ;;  %p268_p9 = scmp.lt.s32.totalorder %s147_s29, %s147_s29 }
  0x18   :  { %211 = vmatprep.subr.bf16.mxu0 %v292_v5  ;;  %v224_v25 = vpack.c.bf16 %v56_v24, %v55_v23  ;;  %v58_v27 = vld [vmem:[#allocation2 + $0x68] sm:$0xff]  ;;  %v59_v30 = vld [vmem:[#allocation2 + $0x70] sm:$0xff]  ;;  %v60_v31 = vld [vmem:[#allocation2 + $0x78] sm:$0xff]  ;;  %p264_p8 = scmp.ne.s32.totalorder %s147_s29, %s263_s30  ;;  %p269_p10 = scmp.lt.s32.totalorder %s263_s30, %s263_s30 }
  0x19   :  { %v227_v29 = vpack.c.bf16 %v58_v27, %v57_v26  ;;  %v230_v32 = vpack.c.bf16 %v60_v31, %v59_v30  ;;  %v155_v38 = vld [vmem:[%s350_s2] ss:$0 sm:$0xff] }
  0x1a   :  { %p270_p11 = por %p269_p10, %p268_p9 }
  0x1b   :  { %213 = vmatpush3.bf16.msra.mxu0 %v212_v8 }
  0x1c   :  { %214 = vmatprep.subr.bf16.mxu0 %v292_v5  ;;  %p271_p12 = pnand %p270_p11, %p264_p8 }
  0x1f   :  { %216 = vmatpush3.bf16.msra.mxu0 %v215_v11 }
  0x20   :  { %217 = vmatprep.subr.bf16.mxu0 %v292_v5 }
  0x23   :  { %219 = vmatpush3.bf16.msra.mxu0 %v218_v14 }
  0x24   :  { %220 = vmatprep.subr.bf16.mxu0 %v292_v5 }
  0x27   :  { %222 = vmatpush3.bf16.msra.mxu0 %v221_v22 }
  0x28   :  { %223 = vmatprep.subr.bf16.mxu0 %v292_v5 }
  0x2b   :  { %225 = vmatpush3.bf16.msra.mxu0 %v224_v25 }
  0x2c   :  { %226 = vmatprep.subr.bf16.mxu0 %v292_v5 }
  0x2f   :  { %228 = vmatpush3.bf16.msra.mxu0 %v227_v29 }
  0x30   :  { %229 = vmatprep.subr.bf16.mxu0 %v292_v5 }
  0x33   :  { %231 = vmatpush3.bf16.msra.mxu0 %v230_v32 }
  0xa2   :  { %v33_v15 = vpop.xlane.xlu0 %32 }
  0xa3   :  { %v35_v16 = vmul.f32 0.0078125, %v33_v15 }
  0xa5   :  { %v36_v17 = vsub.f32 %v29_v0, %v35_v16 }
  0xa7   :  { %v37_v18 = vmul.f32 %v36_v17, %v36_v17 }
  0xa9   :  { %v38_v19 = vsel %vm30_vm0, %v37_v18, 0.0 }
  0xaa   :  { %39 = vadd.xlane.f32.xlu0 %v38_v19 }
 0x137   :  { %v40_v33 = vpop.xlane.xlu0 %39 }
 0x138   :  { %v41_v34 = vmul.f32 0.0078125, %v40_v33 }
 0x13a   :  { %v42_v35 = vadd.f32 1e-12, %v41_v34 }
 0x13c   :  { %239 = vrsqrt.f32 %v42_v35 }
 0x146   :  { %v240_v36 = vpop.eup %239 }
 0x147   :  { %v44_v37 = vmul.f32 %v240_v36, %v36_v17 }
 0x149   :  { %206 = vmatmul.mubr.f32.vlgmr.msra.gmra.mrb[0].mxu0 %v44_v37 }
 0x21c   :  { %v134_v39 = vpop.f32.mrb[0].mxu0 }
 0x21d   :  { %v135_v40 = vadd.f32 %v155_v38, %v134_v39  ;;  %v207_v41 = vpop.f32.mrb[1].mxu0 }
 0x21f   :  { %139 = vst.msk [vmem:[#allocation5] sm:$0x3] %vm138_vm2, %v135_v40 }
 0x220   :  { %274 = shalt.err (!%p271_p12)
}
 0x221   :  { %s275_s6 = scalar_lea.hbm %s351_s3, 32 }
 0x222   :  { %p276_p13 = scmp.ne.s32.totalorder %s351_s3, %s275_s6  ;;  %p279_p0 = scmp.lt.u32.totalorder %s275_s6, %s351_s3 }
 0x224   :  { %p281_p1 = pnand %p279_p0, %p276_p13 }
 0x226   :  { %284 = shalt.err (!%p281_p1)
}
 0x227   :  { %149 = dma.vmem_to_hbm [thread:$0]  %s147_s29, 32, %s351_s3, [#allocation4]  }
 0x228   :  { %287 = dma.done.wait [#allocation4], 32  }
 0x229   :  { %288 = vsyncadd [#allocation4], 4294967264 }
 0x22a   :  { %153 = vsyncpa [#allocation3], 1 }
 0x22b   :  { %154 = vsyncpa [#allocation4], 1 }

</bundles_post_ra>
